<compile_context>
chip_gen: v7x
topology: tpu7x:2x2x1
jax: 0.10.0
libtpu: 0.0.40
codegen_flags: <defaults>
</compile_context>

<pallas_src>
import jax
import jax.numpy as jnp
from jax.experimental import pallas as pl
from jax.experimental.pallas import tpu as pltpu

_LANES = 1024        # lane-dense slab width (multiple of 128)
_SUBLANES = 8        # sublane multiple for f32 tiles
_BLOCK_ROWS = 512    # 512 x 1024 f32 = 2 MiB per block


def _round_up(a: int, b: int) -> int:
    return ((a + b - 1) // b) * b


def _make_temperature_kernel(T: float):
    t = float(T)

    def kernel(x_ref, o_ref):
        # Elementwise divide on the VPU; T folds into an immediate constant.
        o_ref[...] = x_ref[...] / t

    return kernel


def temperature(x, T: float = 1.0):
    """Computes x / T (PyTorch `Temporature.forward`) with a Pallas TPU kernel."""
    orig_shape = x.shape
    n = int(x.size)
    if n == 0:
        return x

    # Row-tile: up to _BLOCK_ROWS, always a multiple of 8 sublanes, and always
    # an exact divisor of the padded row count (no whole-array fallback).
    rows_needed = _round_up(pl.cdiv(n, _LANES), _SUBLANES)
    tr = min(_BLOCK_ROWS, rows_needed)
    rows = _round_up(rows_needed, tr)
    n_pad = rows * _LANES

    x_flat = jnp.ravel(x)
    if n_pad != n:
        x_flat = jnp.pad(x_flat, (0, n_pad - n))
    x2d = x_flat.reshape(rows, _LANES)

    out2d = pl.pallas_call(
        _make_temperature_kernel(T),
        out_shape=jax.ShapeDtypeStruct((rows, _LANES), x2d.dtype),
        grid_spec=pl.GridSpec(
            grid=(rows // tr,),
            in_specs=[pl.BlockSpec((tr, _LANES), lambda i: (i, 0))],
            out_specs=pl.BlockSpec((tr, _LANES), lambda i: (i, 0)),
        ),
        compiler_params=pltpu.CompilerParams(
            dimension_semantics=("parallel",)),
        cost_estimate=pl.CostEstimate(
            flops=n,
            transcendentals=0,
            bytes_accessed=2 * n * x.dtype.itemsize),
    )(x2d)

    out_flat = out2d.reshape(-1)
    if n_pad != n:
        out_flat = out_flat[:n]
    return out_flat.reshape(orig_shape)


if __name__ == "__main__":
    key = jax.random.PRNGKey(0)
    x = jax.random.normal(key, (2, 4, 16, 16), dtype=jnp.float32)
    T = 2.5

    y = temperature(x, T)
    jax.block_until_ready(y)

    # correctness check against plain JAX reference (== torch x / T)
    ref = x / T
    assert y.shape == x.shape and y.dtype == x.dtype
    assert jnp.allclose(y, ref, atol=1e-6, rtol=1e-6)
    print("KERNEL_OK")
</pallas_src>

<mosaic_0001>
module attributes {stable_mosaic.version = 11 : i64} {
  func.func @kernel(%arg0: i32, %arg1: memref<8x1024xf32, #tpu.memory_space<vmem>>, %arg2: memref<8x1024xf32, #tpu.memory_space<vmem>>) attributes {dimension_semantics = [#tpu.dimension_semantics<parallel>], iteration_bounds = array<i64: 1>, scalar_prefetch = 0 : i64, scratch_operands = 0 : i64, tpu.core_type = #tpu.core_type<tc>, window_params = [{transform_indices = @transform_0, window_bounds = array<i64: 8, 1024>}, {transform_indices = @transform_1, window_bounds = array<i64: 8, 1024>}]} {
    %c0 = arith.constant 0 : index
    %c0_0 = arith.constant 0 : index
    %0 = vector.load %arg1[%c0, %c0_0] : memref<8x1024xf32, #tpu.memory_space<vmem>>, vector<8x1024xf32>
    %cst = arith.constant 2.500000e+00 : f32
    %1 = vector.broadcast %cst : f32 to vector<8x1024xf32>
    %2 = arith.divf %0, %1 : vector<8x1024xf32>
    %c0_1 = arith.constant 0 : index
    %c0_2 = arith.constant 0 : index
    %3 = vector.load %arg2[%c0_1, %c0_2] : memref<8x1024xf32, #tpu.memory_space<vmem>>, vector<8x1024xf32>
    tpu.vector_store %arg2[%c0_1, %c0_2], %2 {strides = array<i32>} : memref<8x1024xf32, #tpu.memory_space<vmem>>, vector<8x1024xf32>,
    return
  }
  func.func @transform_0(%arg0: i32) -> (i32, i32) {
    %c0_i32 = arith.constant 0 : i32
    %c0_i32_0 = arith.constant 0 : i32
    return %arg0, %c0_i32 : i32, i32
  }
  func.func @transform_1(%arg0: i32) -> (i32, i32) {
    %c0_i32 = arith.constant 0 : i32
    %c0_i32_0 = arith.constant 0 : i32
    return %arg0, %c0_i32 : i32, i32
  }
}

</mosaic_0001>

<bundles_post_ra>
// kernel: tpu_custom_call.1
= control target key start
LH: loop header
LB: loop body
LE: loop exit
PB: predicated region body
PF: predicated region fallthrough
CT: control target
= control target key end

     0   :  { %6 = vsyncpa [#allocation3], 0  ;;  %s147_s0 = inlined_call_operand.hbm [shape: f32[8,1024], index: 0, kind: input, shape index: {}]   ;;  %s148_s1 = inlined_call_operand.hbm [shape: f32[8,1024], index: 1, kind: output, shape index: {}]  }
   0x1   :  { %7 = vsyncpa [#allocation4], 0  ;;  %s111_s6 = smov [#allocation2]   ;;  %s63_s10 = scalar_lea.hbm %s147_s0, 1024 }
   0x2   :  { %s14_s7 = sshll.u32 %s111_s6, 4  ;;  %p64_p0 = scmp.ne.s32.totalorder %s147_s0, %s63_s10  ;;  %s15_s7 = int_to_ptr.vmem [resolvable:$true] %s14_s7 }
   0x3   :  { %p67_p1 = scmp.lt.u32.totalorder %s63_s10, %s147_s0 }
   0x5   :  { %p69_p2 = pnand %p67_p1, %p64_p0 }
   0x7   :  { %72 = shalt.err (!%p69_p2)
}
   0x8   :  { %s73_s15 = scalar_lea.vmem %s15_s7, 1024  ;;  %p78_p4 = scmp.lt.s32.totalorder %s15_s7, %s15_s7 }
   0x9   :  { %p74_p3 = scmp.ne.s32.totalorder %s15_s7, %s73_s15  ;;  %p79_p5 = scmp.lt.s32.totalorder %s73_s15, %s73_s15 }
   0xb   :  { %p80_p6 = por %p79_p5, %p78_p4 }
   0xd   :  { %p81_p7 = pnand %p80_p6, %p74_p3 }
   0xf   :  { %84 = shalt.err (!%p81_p7)
}
  0x10   :  { %17 = dma.hbm_to_vmem [thread:$0]  %s147_s0, 1024, %s15_s7, [#allocation3]  }
  0x11   :  { %107 = dma.done.wait [#allocation3], 1024  }
  0x12   :  { %108 = vsyncadd [#allocation3], 4294966272  ;;  %v21_v0 = vld [vmem:[#allocation2] sm:$0xff]  ;;  %v22_v1 = vld [vmem:[#allocation2 + $0x8] sm:$0xff]  ;;  %s112_s18 = smov [#allocation5]  }
  0x13   :  { %v23_v2 = vld [vmem:[#allocation2 + $0x10] sm:$0xff]  ;;  %v30_v3 = vmul.f32 0.4, %v21_v0  ;;  %v31_v4 = vmul.f32 0.4, %v22_v1  ;;  %v24_v6 = vld [vmem:[#allocation2 + $0x18] sm:$0xff] }
  0x14   :  { %v32_v5 = vmul.f32 0.4, %v23_v2  ;;  %v25_v7 = vld [vmem:[#allocation2 + $0x20] sm:$0xff]  ;;  %v26_v8 = vld [vmem:[#allocation2 + $0x28] sm:$0xff]  ;;  %s52_s19 = sshll.u32 %s112_s18, 4  ;;  %v27_v12 = vld [vmem:[#allocation2 + $0x30] sm:$0xff]  ;;  %s53_s19 = int_to_ptr.vmem [resolvable:$true] %s52_s19 }
  0x15   :  { %38 = vst [vmem:[#allocation5] sm:$0xff] %v30_v3  ;;  %39 = vst [vmem:[#allocation5 + $0x8] sm:$0xff] %v31_v4  ;;  %v33_v9 = vmul.f32 0.4, %v24_v6  ;;  %v34_v10 = vmul.f32 0.4, %v25_v7  ;;  %p90_p9 = scmp.lt.s32.totalorder %s53_s19, %s53_s19 }
  0x16   :  { %40 = vst [vmem:[#allocation5 + $0x10] sm:$0xff] %v32_v5  ;;  %v35_v11 = vmul.f32 0.4, %v26_v8  ;;  %v28_v13 = vld [vmem:[#allocation2 + $0x38] sm:$0xff]  ;;  %v36_v14 = vmul.f32 0.4, %v27_v12 }
  0x17   :  { %41 = vst [vmem:[#allocation5 + $0x18] sm:$0xff] %v33_v9  ;;  %42 = vst [vmem:[#allocation5 + $0x20] sm:$0xff] %v34_v10  ;;  %v37_v15 = vmul.f32 0.4, %v28_v13  ;;  %s85_s0 = scalar_lea.vmem %s53_s19, 1024 }
  0x18   :  { %43 = vst [vmem:[#allocation5 + $0x28] sm:$0xff] %v35_v11  ;;  %44 = vst [vmem:[#allocation5 + $0x30] sm:$0xff] %v36_v14  ;;  %p86_p8 = scmp.ne.s32.totalorder %s53_s19, %s85_s0  ;;  %p91_p10 = scmp.lt.s32.totalorder %s85_s0, %s85_s0 }
  0x19   :  { %45 = vst [vmem:[#allocation5 + $0x38] sm:$0xff] %v37_v15 }
  0x1a   :  { %p92_p11 = por %p91_p10, %p90_p9 }
  0x1c   :  { %p93_p12 = pnand %p92_p11, %p86_p8 }
  0x1e   :  { %96 = shalt.err (!%p93_p12)
}
  0x1f   :  { %s97_s22 = scalar_lea.hbm %s148_s1, 1024 }
  0x20   :  { %p98_p13 = scmp.ne.s32.totalorder %s148_s1, %s97_s22  ;;  %p101_p0 = scmp.lt.u32.totalorder %s97_s22, %s148_s1 }
  0x22   :  { %p103_p1 = pnand %p101_p0, %p98_p13 }
  0x24   :  { %106 = shalt.err (!%p103_p1)
}
  0x25   :  { %55 = dma.vmem_to_hbm [thread:$0]  %s53_s19, 1024, %s148_s1, [#allocation4]  }
  0x26   :  { %109 = dma.done.wait [#allocation4], 1024  }
  0x27   :  { %110 = vsyncadd [#allocation4], 4294966272 }
  0x28   :  { %59 = vsyncpa [#allocation3], 1 }
  0x29   :  { %60 = vsyncpa [#allocation4], 1 }

</bundles_post_ra>
